<compile_context>
chip_gen: v7x
topology: tpu7x:2x2x1
jax: 0.10.0
libtpu: 0.0.40
codegen_flags: <defaults>
</compile_context>

<pallas_src>
from functools import partial

import jax
import jax.numpy as jnp
from jax import lax
from jax.experimental import pallas as pl
from jax.experimental.pallas import tpu as pltpu

# ---------------- test-problem sizes ----------------
N, CIN, COUT = 2, 4, 8
H, W = 16, 16
K = 3
EPS = 1e-5


def _fused_sepconv_kernel(patches_ref, w_ref, o_ref):
    # patches_ref: (Cin*K*K+1, N*H*W)  im2col slab + ones row (lane-dense, 512 lanes)
    # w_ref:       (Cout, Cin*K*K+1)   fused depthwise*BN*pointwise weights + bias col
    # o_ref:       (Cout, N*H*W)       lane-dense output
    o_ref[...] = jnp.dot(
        w_ref[...], patches_ref[...], preferred_element_type=jnp.float32
    ).astype(o_ref.dtype)


@partial(jax.jit, static_argnames=("stride", "dilation", "eps"))
def separable_conv2d(x, w_dw, gamma, beta, run_mean, run_var, w_pw,
                     *, stride=1, dilation=1, eps=EPS):
    """x: (N, Cin, H, W) -> (N, Cout, H, W). Shapes derived from the inputs."""
    n, cin, h, w = x.shape
    cout = w_pw.shape[0]
    k = w_dw.shape[-1]
    assert w_pw.shape[1] == cin and w_dw.shape[0] == cin and w_dw.shape[-2] == k
    assert stride == 1  # TODO(synk): stride > 1 not implemented (module default is 1)
    # Module's own padding rule (matches the PyTorch spec exactly).
    pad = dilation if dilation > k // 2 else k // 2

    f32 = jnp.float32
    x = x.astype(f32)

    # ---- fold BN (inference mode) into weights + per-Cout bias, all in f32 ----
    scale = gamma.astype(f32) / jnp.sqrt(run_var.astype(f32) + eps)          # (Cin,)
    shift = beta.astype(f32) - run_mean.astype(f32) * scale                  # (Cin,)
    dw = w_dw.reshape(cin, k, k).astype(f32)                                 # (Cin,K,K)
    pw = w_pw.reshape(cout, cin).astype(f32)                                 # (Cout,Cin)
    w_fused = (pw[:, :, None, None] * scale[None, :, None, None] * dw[None]
               ).reshape(cout, cin * k * k)                                  # (Cout, Cin*K*K)
    bias = pw @ shift                                                        # (Cout,)
    w_aug = jnp.concatenate([w_fused, bias[:, None]], axis=1)                # (Cout, Cin*K*K+1)

    # ---- im2col slab with batch folded into the lane dim (layout plumbing only) ----
    x_pad = jnp.pad(x, ((0, 0), (0, 0), (pad, pad), (pad, pad)))
    taps = [x_pad[:, :, kh * dilation:kh * dilation + h, kw * dilation:kw * dilation + w]
            for kh in range(k) for kw in range(k)]                           # K*K x (N,Cin,H,W)
    patches = jnp.stack(taps, axis=2)                                        # (N,Cin,K*K,H,W)
    patches = patches.transpose(1, 2, 0, 3, 4).reshape(cin * k * k, n * h * w)
    ones_row = jnp.ones((1, n * h * w), f32)
    patches_aug = jnp.concatenate([patches, ones_row], axis=0)               # (Cin*K*K+1, N*H*W)

    # Single-step kernel: whole operands live in VMEM (working set ~100 KiB, far
    # under v7x's 64 MiB physical / 32 MiB default scoped VMEM).
    out = pl.pallas_call(
        _fused_sepconv_kernel,
        out_shape=jax.ShapeDtypeStruct((cout, n * h * w), f32),
        in_specs=[pl.BlockSpec(memory_space=pltpu.MemorySpace.VMEM),
                  pl.BlockSpec(memory_space=pltpu.MemorySpace.VMEM)],
        out_specs=pl.BlockSpec(memory_space=pltpu.MemorySpace.VMEM),
    )(patches_aug, w_aug)

    # (Cout, N*H*W) -> (N, Cout, H, W)
    return out.reshape(cout, n, h, w).transpose(1, 0, 2, 3)


def _reference(x, w_dw, gamma, beta, run_mean, run_var, w_pw, *, dilation=1, eps=EPS):
    """Pure-JAX reference using lax conv (NCHW, same semantics as PyTorch)."""
    cin = x.shape[1]
    k = w_dw.shape[-1]
    pad = dilation if dilation > k // 2 else k // 2
    dn = lax.conv_dimension_numbers(x.shape, w_dw.shape, ("NCHW", "OIHW", "NCHW"))
    y = lax.conv_general_dilated(
        x, w_dw, window_strides=(1, 1), padding=((pad, pad), (pad, pad)),
        rhs_dilation=(dilation, dilation), dimension_numbers=dn, feature_group_count=cin)
    scale = gamma / jnp.sqrt(run_var + eps)
    shift = beta - run_mean * scale
    y = y * scale[None, :, None, None] + shift[None, :, None, None]
    dn2 = lax.conv_dimension_numbers(y.shape, w_pw.shape, ("NCHW", "OIHW", "NCHW"))
    return lax.conv_general_dilated(
        y, w_pw, window_strides=(1, 1), padding=((0, 0), (0, 0)), dimension_numbers=dn2)


if __name__ == "__main__":
    key = jax.random.PRNGKey(0)
    kx, kdw, kpw, kg, kb, km, kv = jax.random.split(key, 7)

    x = jax.random.normal(kx, (N, CIN, H, W), jnp.float32)
    # depthwise weights: (CIN, 1, K, K), pointwise: (COUT, CIN, 1, 1)  (PyTorch OIHW)
    w_dw = jax.random.normal(kdw, (CIN, 1, K, K), jnp.float32) * 0.2
    w_pw = jax.random.normal(kpw, (COUT, CIN, 1, 1), jnp.float32) * 0.2
    gamma = 1.0 + 0.1 * jax.random.normal(kg, (CIN,), jnp.float32)
    beta = 0.1 * jax.random.normal(kb, (CIN,), jnp.float32)
    run_mean = 0.1 * jax.random.normal(km, (CIN,), jnp.float32)
    run_var = jnp.abs(1.0 + 0.1 * jax.random.normal(kv, (CIN,), jnp.float32))

    out = separable_conv2d(x, w_dw, gamma, beta, run_mean, run_var, w_pw)
    out = jax.block_until_ready(out)

    ref = _reference(x, w_dw, gamma, beta, run_mean, run_var, w_pw)
    assert out.shape == (N, COUT, H, W)
    assert jnp.allclose(out, ref, rtol=1e-3, atol=1e-3), "mismatch vs reference"

    print("KERNEL_OK")
</pallas_src>

<mosaic_0001>
module attributes {stable_mosaic.version = 11 : i64} {
  func.func @_fused_sepconv_kernel(%arg0: memref<37x512xf32, #tpu.memory_space<vmem>>, %arg1: memref<8x37xf32, #tpu.memory_space<vmem>>, %arg2: memref<8x512xf32, #tpu.memory_space<vmem>>) attributes {dimension_semantics = [], scalar_prefetch = 0 : i64, scratch_operands = 0 : i64, tpu.core_type = #tpu.core_type<tc>} {
    %c0 = arith.constant 0 : index
    %c0_0 = arith.constant 0 : index
    %0 = vector.load %arg1[%c0, %c0_0] : memref<8x37xf32, #tpu.memory_space<vmem>>, vector<8x37xf32>
    %c0_1 = arith.constant 0 : index
    %c0_2 = arith.constant 0 : index
    %1 = vector.load %arg0[%c0_1, %c0_2] : memref<37x512xf32, #tpu.memory_space<vmem>>, vector<37x512xf32>
    %cst = arith.constant dense<0.000000e+00> : vector<8x512xf32>
    %2 = tpu.matmul %0, %1, %cst {dimension_numbers = #tpu.dot_dimension_numbers<[1], [0], [0], [1], [0, 0, 1, 1], [], []>} : vector<8x37xf32>, vector<37x512xf32>, vector<8x512xf32> -> vector<8x512xf32>
    %c0_3 = arith.constant 0 : index
    %c0_4 = arith.constant 0 : index
    %3 = vector.load %arg2[%c0_3, %c0_4] : memref<8x512xf32, #tpu.memory_space<vmem>>, vector<8x512xf32>
    tpu.vector_store %arg2[%c0_3, %c0_4], %2 {strides = array<i32>} : memref<8x512xf32, #tpu.memory_space<vmem>>, vector<8x512xf32>,
    return
  }
}

</mosaic_0001>

<bundles_post_ra>
// kernel: separable_conv2d.1
= control target key start
LH: loop header
LB: loop body
LE: loop exit
PB: predicated region body
PF: predicated region fallthrough
CT: control target
= control target key end

     0   :  { %v222_v3 = vmov 0.0   ;;  %vm36_vm0 = vcmask 1044480   ;;  %vm32_vm1 = vcmask 302080   ;;  %s313_s0 = inlined_call_operand.vmem [shape: f32[37,512], index: 0, kind: input, shape index: {}]   ;;  %s314_s1 = inlined_call_operand.vmem [shape: f32[8,37], index: 1, kind: input, shape index: {}]   ;;  %s315_s2 = inlined_call_operand.vmem [shape: f32[8,512], index: 2, kind: output, shape index: {}]  }
   0x1   :  { %v13_v0 = vld [vmem:[%s313_s0 + $0x8] sm:$0xff]  ;;  %v15_v2 = vld [vmem:[%s313_s0 + $0x18] sm:$0xff]  ;;  %113 = vmatprep.mubr.f32.mxu0 %v222_v3  ;;  %184 = vmatprep.mubr.f32.mxu1 %v222_v3  ;;  %v12_v6 = vld [vmem:[%s313_s0] sm:$0xff] }
   0x2   :  { %v17_v1 = vld [vmem:[%s313_s0 + $0x28] sm:$0xff]  ;;  %v19_v5 = vld [vmem:[%s313_s0 + $0x38] sm:$0xff]  ;;  %v16_v7 = vld [vmem:[%s313_s0 + $0x20] sm:$0xff] }
   0x3   :  { %v205_v4 = vpack.c.bf16 %v17_v1, %v13_v0  ;;  %v213_v8 = vpack.c.bf16 %v19_v5, %v15_v2  ;;  %v207_v9 = vpack.c.bf16 %v16_v7, %v12_v6  ;;  %v14_v10 = vld [vmem:[%s313_s0 + $0x10] sm:$0xff]  ;;  %v21_v12 = vld [vmem:[%s313_s0 + $0x48] sm:$0xff]  ;;  %v23_v15 = vld [vmem:[%s313_s0 + $0x58] sm:$0xff] }
   0x4   :  { %v18_v11 = vld [vmem:[%s313_s0 + $0x30] sm:$0xff]  ;;  %v25_v14 = vld [vmem:[%s313_s0 + $0x68] sm:$0xff]  ;;  %v27_v16 = vld [vmem:[%s313_s0 + $0x78] sm:$0xff] }
   0x5   :  { %206 = vmatprep.subr.bf16.mxu0 %v205_v4  ;;  %v215_v13 = vpack.c.bf16 %v18_v11, %v14_v10  ;;  %214 = vmatprep.subr.bf16.mxu1 %v213_v8  ;;  %v209_v17 = vpack.c.bf16 %v25_v14, %v21_v12  ;;  %v217_v18 = vpack.c.bf16 %v27_v16, %v23_v15  ;;  %v20_v19 = vld [vmem:[%s313_s0 + $0x40] sm:$0xff]  ;;  %v22_v21 = vld [vmem:[%s313_s0 + $0x50] sm:$0xff]  ;;  %v29_v25 = vld [vmem:[%s313_s0 + $0x88] sm:$0x1f] }
   0x6   :  { %208 = vmatpush1.bf16.msra.mxu0 %v207_v9  ;;  %v24_v20 = vld [vmem:[%s313_s0 + $0x60] sm:$0xff]  ;;  %v26_v23 = vld [vmem:[%s313_s0 + $0x70] sm:$0xff]  ;;  %v31_v26 = vld [vmem:[%s313_s0 + $0x98] sm:$0x1f] }
   0x7   :  { %216 = vmatpush1.bf16.msra.mxu1 %v215_v13  ;;  %v211_v22 = vpack.c.bf16 %v24_v20, %v20_v19  ;;  %210 = vmatprep.subr.bf16.mxu0 %v209_v17  ;;  %v219_v24 = vpack.c.bf16 %v26_v23, %v22_v21  ;;  %v28_v27 = vld [vmem:[%s313_s0 + $0x80] sm:$0x1f]  ;;  %v30_v28 = vld [vmem:[%s313_s0 + $0x90] sm:$0x1f] }
   0x8   :  { %218 = vmatprep.subr.bf16.mxu1 %v217_v18  ;;  %v11_v29 = vld [vmem:[%s314_s1] sm:$0xff] }
   0xa   :  { %212 = vmatpush1.bf16.msra.mxu0 %v211_v22 }
   0xb   :  { %220 = vmatpush1.bf16.msra.mxu1 %v219_v24  ;;  %199 = vmatprep.subr.msk.mxu0 %vm36_vm0, %v29_v25 }
   0xc   :  { %202 = vmatprep.subr.msk.mxu1 %vm36_vm0, %v31_v26 }
   0xe   :  { %200 = vmatpush1.msk.msra.mxu0 %vm36_vm0, %v28_v27 }
   0xf   :  { %203 = vmatpush1.msk.msra.mxu1 %vm36_vm0, %v30_v28  ;;  %201 = vmatmul.mubr.msk.f32.vlgmr.msra.gmra.mrb[0].mxu0 %vm32_vm1, %v11_v29 }
  0x10   :  { %204 = vmatmul.mubr.msk.f32.vlgmr.msra.gmra.mrb[0].mxu1 %vm32_vm1, %v11_v29 }
  0xe2   :  { %v115_v30 = vpop.f32.mrb[0].mxu0 }
  0xe3   :  { %191 = vst [vmem:[%s315_s2] sm:$0xff] %v115_v30  ;;  %v186_v31 = vpop.f32.mrb[0].mxu1  ;;  %v117_v32 = vpop.f32.mrb[1].mxu0 }
  0xe4   :  { %193 = vst [vmem:[%s315_s2 + $0x10] sm:$0xff] %v186_v31  ;;  %192 = vst [vmem:[%s315_s2 + $0x8] sm:$0xff] %v117_v32  ;;  %v188_v33 = vpop.f32.mrb[1].mxu1 }
  0xe5   :  { %194 = vst [vmem:[%s315_s2 + $0x18] sm:$0xff] %v188_v33 }

</bundles_post_ra>
